<compile_context>
chip_gen: v6e
topology: v6e:2x2x1
jax: 0.10.0
libtpu: 0.0.40
codegen_flags: <defaults>
</compile_context>

<pallas_src>
import jax
import jax.numpy as jnp
from jax.experimental import pallas as pl
from jax.experimental.pallas import tpu as pltpu


_LANE = 128
_SUBLANE_F32 = 8


def _round_up(x, m):
    return ((x + m - 1) // m) * m


def _conv_matmul_kernel(p_ref, w_ref, b_ref, o_ref):
    """One grid step: ReLU(W @ P^T + b), channel-major output.

    p_ref : (Kp, TM)     VMEM  im2col patch tile, transposed (K on sublanes,
                               output pixels on lanes)
    w_ref : (Coutp, Kp)  VMEM  weights (same block every step -> stays resident)
    b_ref : (Coutp, 1)   VMEM  bias
    o_ref : (Coutp, TM)  VMEM  lane-dense, channel-major output tile
    """
    acc = jnp.dot(w_ref[...], p_ref[...], preferred_element_type=jnp.float32)
    y = acc + b_ref[...]                       # broadcast (Coutp, 1) over lanes
    o_ref[...] = jnp.maximum(y, 0.0).astype(o_ref.dtype)


def basic_conv2d(x_nchw, weight_oihw, bias, *, stride=1, dilation=1, max_tile_m=512):
    """Forward pass of BasicConv2d (bn=False): ReLU(conv2d(x, W) + b), padding=0.

    x_nchw      : (N, Cin, H, W)      float32
    weight_oihw : (Cout, Cin, KH, KW) float32 (PyTorch layout)
    bias        : (Cout,)             float32
    returns     : (N, Cout, Ho, Wo)   float32
    """
    N, Cin, H, W = x_nchw.shape
    Cout, _, KH, KW = weight_oihw.shape
    Ho = (H - dilation * (KH - 1) - 1) // stride + 1
    Wo = (W - dilation * (KW - 1) - 1) // stride + 1
    K = KH * KW * Cin          # contraction dim
    M = Ho * Wo                # per-image output pixels (lane dim)

    # ---- tiling / minimal padding ----
    # K only needs sublane (8) alignment in the transposed layout; the pixel
    # (lane) dim is padded to a multiple of the lane tile; Cout to the sublane.
    TM = min(_round_up(M, _LANE), max_tile_m)
    Mp = _round_up(M, TM)
    Kp = _round_up(K, _SUBLANE_F32)
    Coutp = _round_up(Cout, _SUBLANE_F32)

    # ---- im2col (layout plumbing only; all FLOPs stay in the Pallas kernel) ----
    # Build P^T directly: (N, K, M) with k flattened as (kh, kw, cin), then a
    # single jnp.pad to the MXU/lane-friendly padded shape (no zeros+scatter).
    cols = []
    for kh in range(KH):
        for kw in range(KW):
            h0 = kh * dilation
            w0 = kw * dilation
            sl = x_nchw[:, :, h0:h0 + (Ho - 1) * stride + 1:stride,
                        w0:w0 + (Wo - 1) * stride + 1:stride]      # (N, Cin, Ho, Wo)
            cols.append(sl.reshape(N, Cin, M))
    patches_t = jnp.concatenate(cols, axis=1)                       # (N, K, M)
    patches_t = jnp.pad(patches_t, ((0, 0), (0, Kp - K), (0, Mp - M)))

    # Weights flattened in the matching (kh, kw, cin) order -> (Coutp, Kp).
    w_mat = jnp.transpose(weight_oihw, (0, 2, 3, 1)).reshape(Cout, K)
    w_p = jnp.pad(w_mat, ((0, Coutp - Cout), (0, Kp - K)))
    b_p = jnp.pad(bias.reshape(Cout, 1), ((0, Coutp - Cout), (0, 0)))

    grid = (N, Mp // TM)       # 2 "parallel" steps at the example size

    # Gen-safe VMEM sizing: double-buffered patch/output tiles + resident
    # weight/bias (f32 bytes), with headroom, capped below v7x's 64 MiB.
    vmem_need = 4 * (2 * Kp * TM + Coutp * Kp + Coutp + 2 * Coutp * TM)
    vmem_limit = int(min(max(4 * vmem_need, 4 * 1024 * 1024), 48 * 1024 * 1024))

    out_p = pl.pallas_call(
        _conv_matmul_kernel,
        out_shape=jax.ShapeDtypeStruct((N, Coutp, Mp), x_nchw.dtype),
        grid_spec=pltpu.PrefetchScalarGridSpec(
            num_scalar_prefetch=0,
            grid=grid,
            in_specs=[
                pl.BlockSpec((None, Kp, TM), lambda b, m: (b, 0, m)),
                pl.BlockSpec((Coutp, Kp), lambda b, m: (0, 0)),
                pl.BlockSpec((Coutp, 1), lambda b, m: (0, 0)),
            ],
            out_specs=pl.BlockSpec((None, Coutp, TM), lambda b, m: (b, 0, m)),
        ),
        compiler_params=pltpu.CompilerParams(
            dimension_semantics=("parallel", "parallel"),
            vmem_limit_bytes=vmem_limit,
        ),
    )(patches_t, w_p, b_p)

    # Output is already channel-major per image: just un-pad and reshape,
    # no NCHW transpose needed.
    return out_p[:, :Cout, :M].reshape(N, Cout, Ho, Wo)


if __name__ == "__main__":
    # Module config: nin=4, nout=8, kernel_size=3, dilation=1, stride=1, bn=False
    N, Cin, H, W = 2, 4, 16, 16
    Cout, Ksz = 8, 3

    key = jax.random.PRNGKey(0)
    kx, kw, kb = jax.random.split(key, 3)
    x = jax.random.normal(kx, (N, Cin, H, W), dtype=jnp.float32)
    weight = jax.random.normal(kw, (Cout, Cin, Ksz, Ksz), dtype=jnp.float32) * 0.1
    bias = jax.random.normal(kb, (Cout,), dtype=jnp.float32) * 0.1

    out = basic_conv2d(x, weight, bias, stride=1, dilation=1)
    out = jax.block_until_ready(out)

    # Pure-JAX reference (same semantics as PyTorch nn.Conv2d + ReLU, padding=0).
    ref = jax.lax.conv_general_dilated(
        x, weight, window_strides=(1, 1), padding="VALID",
        rhs_dilation=(1, 1), dimension_numbers=("NCHW", "OIHW", "NCHW"))
    ref = jnp.maximum(ref + bias[None, :, None, None], 0.0)

    assert out.shape == (N, Cout, H - Ksz + 1, W - Ksz + 1), out.shape
    assert jnp.allclose(out, ref, atol=1e-4, rtol=1e-4), \
        float(jnp.max(jnp.abs(out - ref)))

    # TODO(synk): BatchNorm2d branch (bn=True) not implemented; module default is bn=False.
    print("KERNEL_OK")
</pallas_src>

<mosaic_0001>
module attributes {stable_mosaic.version = 11 : i64} {
  func.func @_conv_matmul_kernel(%arg0: i32, %arg1: i32, %arg2: memref<1x40x256xf32, #tpu.memory_space<vmem>>, %arg3: memref<8x40xf32, #tpu.memory_space<vmem>>, %arg4: memref<8x1xf32, #tpu.memory_space<vmem>>, %arg5: memref<1x8x256xf32, #tpu.memory_space<vmem>>) attributes {dimension_semantics = [#tpu.dimension_semantics<parallel>, #tpu.dimension_semantics<parallel>], iteration_bounds = array<i64: 2, 1>, scalar_prefetch = 0 : i64, scratch_operands = 0 : i64, tpu.core_type = #tpu.core_type<tc>, window_params = [{transform_indices = @transform_0, window_bounds = array<i64: 1, 40, 256>}, {pipeline_mode = #tpu.pipeline_mode<synchronous>, transform_indices = @transform_1, window_bounds = array<i64: 8, 40>}, {pipeline_mode = #tpu.pipeline_mode<synchronous>, transform_indices = @transform_2, window_bounds = array<i64: 8, 1>}, {transform_indices = @transform_3, window_bounds = array<i64: 1, 8, 256>}]} {
    %c0 = arith.constant 0 : index
    %c0_0 = arith.constant 0 : index
    %0 = vector.load %arg3[%c0, %c0_0] : memref<8x40xf32, #tpu.memory_space<vmem>>, vector<8x40xf32>
    %c0_1 = arith.constant 0 : index
    %c0_2 = arith.constant 0 : index
    %c0_3 = arith.constant 0 : index
    %1 = vector.load %arg2[%c0_1, %c0_2, %c0_3] : memref<1x40x256xf32, #tpu.memory_space<vmem>>, vector<1x40x256xf32>
    %2 = vector.shape_cast %1 : vector<1x40x256xf32> to vector<40x256xf32>
    %cst = arith.constant dense<0.000000e+00> : vector<8x256xf32>
    %3 = tpu.matmul %0, %2, %cst {dimension_numbers = #tpu.dot_dimension_numbers<[1], [0], [0], [1], [0, 0, 1, 1], [], []>} : vector<8x40xf32>, vector<40x256xf32>, vector<8x256xf32> -> vector<8x256xf32>
    %c0_4 = arith.constant 0 : index
    %c0_5 = arith.constant 0 : index
    %4 = vector.load %arg4[%c0_4, %c0_5] : memref<8x1xf32, #tpu.memory_space<vmem>>, vector<8x1xf32>
    %5 = vector.broadcast %4 : vector<8x1xf32> to vector<8x256xf32>
    %6 = arith.addf %3, %5 : vector<8x256xf32>
    %cst_6 = arith.constant 0.000000e+00 : f32
    %7 = vector.broadcast %cst_6 : f32 to vector<8x256xf32>
    %8 = arith.maximumf %6, %7 : vector<8x256xf32>
    %c0_7 = arith.constant 0 : index
    %c0_8 = arith.constant 0 : index
    %c0_9 = arith.constant 0 : index
    %9 = vector.load %arg5[%c0_7, %c0_8, %c0_9] : memref<1x8x256xf32, #tpu.memory_space<vmem>>, vector<1x8x256xf32>
    %10 = vector.shape_cast %9 : vector<1x8x256xf32> to vector<8x256xf32>
    %11 = vector.shape_cast %8 : vector<8x256xf32> to vector<1x8x256xf32>
    tpu.vector_store %arg5[%c0_7, %c0_8, %c0_9], %11 {strides = array<i32>} : memref<1x8x256xf32, #tpu.memory_space<vmem>>, vector<1x8x256xf32>,
    return
  }
  func.func @transform_0(%arg0: i32, %arg1: i32) -> (i32, i32, i32) {
    %c0_i32 = arith.constant 0 : i32
    %c0_i32_0 = arith.constant 0 : i32
    return %arg0, %c0_i32, %arg1 : i32, i32, i32
  }
  func.func @transform_1(%arg0: i32, %arg1: i32) -> (i32, i32) {
    %c0_i32 = arith.constant 0 : i32
    %c0_i32_0 = arith.constant 0 : i32
    %c0_i32_1 = arith.constant 0 : i32
    return %c0_i32, %c0_i32_0 : i32, i32
  }
  func.func @transform_2(%arg0: i32, %arg1: i32) -> (i32, i32) {
    %c0_i32 = arith.constant 0 : i32
    %c0_i32_0 = arith.constant 0 : i32
    %c0_i32_1 = arith.constant 0 : i32
    return %c0_i32, %c0_i32_0 : i32, i32
  }
  func.func @transform_3(%arg0: i32, %arg1: i32) -> (i32, i32, i32) {
    %c0_i32 = arith.constant 0 : i32
    %c0_i32_0 = arith.constant 0 : i32
    return %arg0, %c0_i32, %arg1 : i32, i32, i32
  }
}

</mosaic_0001>

<bundles_post_ra>
// kernel: tpu_custom_call.1
= control target key start
LH: loop header
LB: loop body
LE: loop exit
PB: predicated region body
PF: predicated region fallthrough
CT: control target
= control target key end

     0   :  { %8 = vsyncpa [#allocation3], 0  ;;  %s765_s0 = inlined_call_operand.hbm [shape: f32[2,40,256], index: 0, kind: input, shape index: {}]   ;;  %s766_s1 = inlined_call_operand.vmem [shape: f32[8,40], index: 1, kind: input, shape index: {}]   ;;  %s767_s2 = inlined_call_operand.vmem [shape: f32[8,1], index: 2, kind: input, shape index: {}]   ;;  %s768_s3 = inlined_call_operand.hbm [shape: f32[2,8,256], index: 3, kind: output, shape index: {}]  }
   0x1   :  { %10 = vsyncpa [#allocation3 + $0x1], 0 }
   0x2   :  { %11 = vsyncpa [#allocation4], 0 }
   0x3   :  { %13 = vsyncpa [#allocation4 + $0x1], 0  ;;  %s626_s12 = smov 0   ;;  %s628_s13 = smov 0  }
   0x4   :  { %s630_s14 = smov 0   ;;  %s632_s15 = smov 0  }
   0x5   :  { %s634_s16 = smov 0   ;;  %s636_s17 = smov 0  }
   0x6 LB: > { %s406_s18 = sadd.s32 4294967295, %s598_s17   ;;  %s407_s19 = sadd.s32 4294967294, %s598_s17   ;;  %s598_s17 = sphi %s636_s17, %s19_s17   ;;  %s594_s16 = sphi %s634_s16, %s779_s16   ;;  %s590_s15 = sphi %s632_s15, %s778_s15   ;;  %s586_s14 = sphi %s630_s14, %s777_s14   ;;  %s582_s13 = sphi %s628_s13, %s776_s13   ;;  %s578_s12 = sphi %s626_s12, %s775_s12  }
   0x7   : > { %s31_s20 = sadd.s32 1, %s594_s16  ;;  %s40_s21 = sadd.s32 1, %s586_s14 }
   0x8   : > { %p33_p0 = scmp.ge.s32.totalorder %s31_s20, 2  ;;  %p47_p1 = scmp.ne.s32.totalorder %s586_s14, %s582_s13 }
   0x9   : > { %p48_p2 = scmp.eq.s32.totalorder %s598_s17, 0  ;;  %p53_p3 = scmp.ne.s32.totalorder %s582_s13, %s578_s12 }
   0xa   : > { %s781_s20 = smov (%p33_p0, %s31_s20), 0  ;;  %p54_p5 = scmp.eq.s32.totalorder %s406_s18, 0 }
   0xb   : > { %p667_p4 = por %p48_p2, %p47_p1  ;;  %s35_s23 = ssub.s32 %s594_s16, %s781_s20 }
   0xc   : > { %p121_p6 = scmp.eq.s32.totalorder %s406_s18, 1  ;;  %p38_p7 = scmp.eq.s32.totalorder %s35_s23, 0 }
   0xd   : > { %p673_p8 = por %p54_p5, %p53_p3  ;;  %p127_p10 = scmp.eq.s32.totalorder %s407_s19, 1 }
   0xe   : > { %p677_p9 = por %p121_p6, %p47_p1  ;;  %p435_p13 = scmp.lt.s32.totalorder %s598_s17, 2 }
   0xf   : > { %s682_s26 = scalar_select %p38_p7, %s586_s14, %s40_s21  }
  0x10   : > { %p684_p11 = por %p127_p10, %p53_p3  ;;  %s153_s28 = sand.u32 1, %s586_s14  }
  0x11   : > { %s420_s29 = smul.u32 80, %s153_s28  ;;  %p694_p0 = pnand %p435_p13, %p667_p4 }
  0x12   : > { %s421_s30 = smul.u32 1280, %s594_s16  ;;  %p411_p1 = scmp.ge.s32.totalorder %s598_s17, 1 }
  0x13   : > { %s157_s8 = scalar_lea.vmem [#allocation2], %s420_s29  ;;  %s154_s10 = scalar_lea.sflag [#allocation3], %s153_s28 }
  0x14   : > { %s165_s7 = scalar_lea.hbm %s765_s0, %s421_s30  ;;  %s166_s9 = sshll.u32 %s157_s8, 4  ;;  %s167_s9 = int_to_ptr.vmem [resolvable:$true] %s166_s9 }
  0x15   : > { %p492_p2 = pneg %p694_p0  ;;  %s503_s11 = scalar_lea.vmem %s167_s9, 1280 }
  0x16   : > { %p504_p3 = scmp.ne.s32.totalorder %s167_s9, %s503_s11  ;;  %s600_s18 = smov [#allocation2]  }
  0x17   : > { %s508_s19 = sshll.u32 %s600_s18, 4  ;;  %s509_s19 = int_to_ptr.vmem [resolvable:$false] %s508_s19 }
  0x18   : > { %p506_p5 = pnand %p504_p3, %p492_p2  ;;  %s510_s21 = scalar_lea.vmem %s509_s19, 2560 }
  0x19   : > { %p511_p4 = scmp.lt.s32.totalorder %s167_s9, %s509_s19  ;;  %p512_p7 = scmp.lt.s32.totalorder %s510_s21, %s503_s11 }
  0x1a   : > { %p507_p6 = pneg %p506_p5 }
  0x1b   : > { %p513_p10 = por %p512_p7, %p511_p4 }
  0x1d   : > { %p514_p13 = pnand %p513_p10, %p507_p6 }
  0x1f   : > { %517 = shalt.err (!%p514_p13)
}
  0x20   : > { %s601_s22 = smov 256   ;;  %s602_s23 = smov 16  }
  0x21   : > { %430 = dma.hbm_to_vmem [thread:$0]  (!%p694_p0), %s165_s7, 1280, %s167_s9, %s154_s10, %s601_s22, %s601_s22, %s602_s23  }
  0x22   : > { %p174_p12 = scmp.lt.s32.totalorder %s598_s17, 3 }
  0x24   : > { %p175_p2 = pnand %p411_p1, %p174_p12 }
  0x25   : > { %s710_s28 = sand.u32 (!%p175_p2), 1, %s582_s13  }
  0x26   : > { %178 = sbr.rel (%p175_p2) target bundleno = 268 (0x10c), region = 32  ;;  %s181_s30 = scalar_lea.sflag (!%p175_p2), [#allocation3], %s710_s28 }
  0x27   : > { %s422_s29 = smul.u32 (!%p175_p2), 80, %s710_s28 }
  0x29   : > { %s184_s5 = scalar_lea.vmem (!%p175_p2), [#allocation2], %s422_s29 }
  0x2b   : > { %569 = dma.done.wait (%p673_p8), %s181_s30, 1280  }
  0x2c   : > { %571 = vsyncadd (%p673_p8), %s181_s30, 4294966016  ;;  %v603_v0 = vmov 0.0   ;;  %v604_v1 = vmov 0   ;;  %v219_v2 = vld [vmem:[%s184_s5 + $0x48] sm:$0xff]  ;;  %v218_v3 = vld [vmem:[%s184_s5 + $0x40] sm:$0xff]  ;;  %vm226_vm0 = vcmask 326656  }
  0x2d   : > { %294 = vmatprep.mubr.f32.mxu0 %v603_v0  ;;  %489 = vset.pattern.permute.xlu0 %v604_v1  ;;  %v217_v4 = vld [vmem:[%s184_s5 + $0x38] sm:$0xff]  ;;  %v216_v5 = vld [vmem:[%s184_s5 + $0x30] sm:$0xff]  ;;  %v215_v6 = vld [vmem:[%s184_s5 + $0x28] sm:$0xff]  ;;  %s412_s8 = sshll.u32 %s710_s28, 4  ;;  %s419_s9 = sshll.u32 %s590_s15, 8 }
  0x2e   : > { %252 = vmatprep.subr.mxu0 %v219_v2  ;;  %v214_v7 = vld [vmem:[%s184_s5 + $0x20] sm:$0xff]  ;;  %v213_v9 = vld [vmem:[%s184_s5 + $0x18] sm:$0xff]  ;;  %v212_v10 = vld [vmem:[%s184_s5 + $0x10] sm:$0xff]  ;;  %s206_s10 = scalar_lea.vmem [#allocation5], %s412_s8  ;;  %s320_s21 = scalar_lea.hbm %s768_s3, %s419_s9 }
  0x2f   : > { %253 = vmatpush1.msra.mxu0 %v218_v3  ;;  %v220_v8 = vld [vmem:[%s767_s2] sm:$0xff]  ;;  %v211_v11 = vld [vmem:[%s184_s5 + $0x8] sm:$0xff]  ;;  %s322_s11 = sshll.u32 %s206_s10, 4  ;;  %s306_s22 = scalar_lea.sflag [#allocation4], %s710_s28  ;;  %s323_s11 = int_to_ptr.vmem [resolvable:$true] %s322_s11 }
  0x30   : > { %254 = vmatprep.subr.mxu0 %v217_v4  ;;  %223 = vperm.xlu0 %489, %v220_v8   ;;  %v210_v12 = vld [vmem:[%s184_s5] sm:$0xff]  ;;  %s518_s23 = scalar_lea.vmem %s323_s11, 256  ;;  %s605_s29 = smov [#allocation5]  }
  0x31   : > { %255 = vmatpush1.msra.mxu0 %v216_v5  ;;  %v209_v13 = vld [vmem:[%s766_s1] sm:$0xff]  ;;  %p519_p8 = scmp.ne.s32.totalorder %s323_s11, %s518_s23  ;;  %s522_s15 = sshll.u32 %s605_s29, 4  ;;  %s523_s15 = int_to_ptr.vmem [resolvable:$false] %s522_s15 }
  0x32   : > { %256 = vmatprep.subr.mxu0 %v215_v6  ;;  %s524_s30 = scalar_lea.vmem %s523_s15, 512  ;;  %p525_p1 = scmp.lt.s32.totalorder %s323_s11, %s523_s15 }
  0x33   : > { %257 = vmatpush1.msra.mxu0 %v214_v7  ;;  %p520_p12 = pnand %p519_p8, %p677_p9  ;;  %p526_p3 = scmp.lt.s32.totalorder %s524_s30, %s518_s23 }
  0x34   : > { %258 = vmatprep.subr.mxu0 %v213_v9 }
  0x35   : > { %259 = vmatpush1.msra.mxu0 %v212_v10  ;;  %p521_p0 = pneg %p520_p12  ;;  %p527_p5 = por %p526_p3, %p525_p1 }
  0x36   : > { %260 = vmatprep.subr.mxu0 %v211_v11 }
  0x37   : > { %261 = vmatpush1.msra.mxu0 %v210_v12  ;;  %p528_p6 = pnand %p527_p5, %p521_p0 }
  0x38   : > { %413 = vmatmul.mubr.msk.f32.vlgmr.msra.gmra.mxu0 %vm226_vm0, %v209_v13 }
  0xab   : > { %v224_v14 = vpop.permute.xlu0 %223 }
  0xf8   : > { %v296_v15 = vpop.f32.mrf.mxu0 }
  0xf9   : > { %v297_v16 = vadd.f32 %v296_v15, %v224_v14 }
  0xfa   : > { %v298_v17 = vpop.f32.mrf.mxu0 }
  0xfb   : > { %v301_v18 = vmax.f32 %v297_v16, 0.0  ;;  %v299_v19 = vadd.f32 %v298_v17, %v224_v14 }
  0xfd   : > { %303 = vst [vmem:[%s206_s10] sm:$0xff] %v301_v18  ;;  %v302_v20 = vmax.f32 %v299_v19, 0.0 }
  0xff   : > { %304 = vst [vmem:[%s206_s10 + $0x8] sm:$0xff] %v302_v20 }
 0x100   : > { %531 = shalt.err (!%p528_p6)
}
 0x101   : > { %s532_s5 = scalar_lea.hbm %s320_s21, 256  ;;  %s536_s6 = scalar_lea.hbm %s768_s3, 512 }
 0x102   : > { %p533_p4 = scmp.ne.s32.totalorder %s320_s21, %s532_s5  ;;  %p537_p13 = scmp.lt.s32.totalorder %s320_s21, %s768_s3 }
 0x103   : > { %p538_p2 = scmp.lt.s32.totalorder %s536_s6, %s532_s5 }
 0x104   : > { %p534_p7 = pnand %p533_p4, %p677_p9 }
 0x105   : > { %p539_p8 = por %p538_p2, %p537_p13 }
 0x106   : > { %p535_p10 = pneg %p534_p7 }
 0x108   : > { %p540_p12 = pnand %p539_p8, %p535_p10 }
 0x10a   : > { %543 = shalt.err (!%p540_p12)
}
 0x10b   : > { %425 = dma.vmem_to_hbm [thread:$0]  (%p677_p9), %s323_s11, 256, %s320_s21, %s306_s22  }
 0x10c PF: > { %s334_s8 = sand.u32 1, %s578_s12   ;;  %p774_p0 = scmp.ge.s32.totalorder %s598_s17, 2 }
 0x10d   : > { %s335_s9 = scalar_lea.sflag [#allocation4], %s334_s8 }
 0x10e   : > { %p432_p1 = pnand %p774_p0, %p684_p11 }
 0x110   : > { %p433_p3 = pneg %p432_p1 }
 0x112   : > { %573 = dma.done.wait (%p433_p3), %s335_s9, 256  }
 0x113   : > { %575 = vsyncadd (%p433_p3), %s335_s9, 4294967040  ;;  %s19_s17 = sadd.s32 1, %s598_s17   ;;  %s775_s12 = smov %s582_s13 }
 0x114   : > { %p16_p5 = scmp.ge.s32.totalorder %s19_s17, 4   ;;  %s776_s13 = smov %s586_s14 }
 0x115   : > { %s777_s14 = smov %s682_s26  ;;  %s778_s15 = smov %s594_s16 }
 0x116   : > { %s779_s16 = smov %s781_s20  ;;  %18 = sbr.rel (!%p16_p5) target bundleno = 6 (0x6), region = 77 }
 0x11b   :  { %340 = vsyncpa [#allocation3], 1 }
 0x11c   :  { %342 = vsyncpa [#allocation3 + $0x1], 1 }
 0x11d   :  { %343 = vsyncpa [#allocation4], 1 }
 0x11e   :  { %345 = vsyncpa [#allocation4 + $0x1], 1 }

</bundles_post_ra>
